<compile_context>
chip_gen: v5e
topology: v5e:2x2
jax: 0.10.0
libtpu: 0.0.40
codegen_flags: <defaults>
</compile_context>

<pallas_src>
import functools

import numpy as np
import jax
import jax.numpy as jnp
from jax import lax
from jax.experimental import pallas as pl
from jax.experimental.pallas import tpu as pltpu


def _downsample_kernel(xph_ref, wlo_ref, whi_ref, b_ref, o_ref, *,
                       stride, ksize, pad, L, L_out, C, T):
    """One (batch, L-tile) step of the fused MaxPool1d || Conv1d downsample.

    xph_ref : (1, 1, s*C, T+1) phase-major slab.  Row block r = phase r of the
              zero-padded input (phase r, column m  <->  x_pad[s*m + r]); the
              slab covers output columns [l*T, (l+1)*T) plus one lookahead col,
              so tap k<s  is rows [k*C:(k+1)*C] at cols [0:T] and tap k>=s is
              rows [(k-s)*C:(k-s+1)*C] at cols [1:T+1] (all unit-stride reads).
    wlo_ref : (C, s*C)      conv weight for taps 0..s-1 (matches phase rows)
    whi_ref : (C, (s-1)*C)  conv weight for taps s..K-1
    b_ref   : (C, 1)        conv bias
    o_ref   : (1, 2C, T)    rows [0:C] = maxpool, [C:2C] = conv
    """
    s = stride
    lt = pl.program_id(1)

    # ---- Conv branch: two MXU matmuls, operands read straight from the ref.
    conv = jnp.dot(wlo_ref[...], xph_ref[0, 0, :, 0:T],
                   preferred_element_type=jnp.float32)
    if s > 1:
        conv = conv + jnp.dot(whi_ref[...],
                              xph_ref[0, 0, 0:(s - 1) * C, 1:T + 1],
                              preferred_element_type=jnp.float32)
    conv = conv + b_ref[...].astype(jnp.float32)

    # ---- Maxpool branch (VPU): max over K taps.  Zero padding is excluded by
    # -inf masking, emitted only (trace time) for taps that can ever touch it.
    col = lt * T + lax.broadcasted_iota(jnp.int32, (1, T), 1)  # global out col
    mp = None
    for k in range(ksize):
        if k < s:
            xk = xph_ref[0, 0, k * C:(k + 1) * C, 0:T]
        else:
            r = k - s
            xk = xph_ref[0, 0, r * C:(r + 1) * C, 1:T + 1]
        touches_left = k < pad                               # only at j == 0
        touches_right = (s * (L_out - 1) + k - pad) >= L     # only last columns
        if touches_left or touches_right:
            pos = s * col + (k - pad)                        # original coords
            xk = jnp.where((pos >= 0) & (pos < L), xk, -jnp.inf)
        mp = xk if mp is None else jnp.maximum(mp, xk)

    o_ref[0, 0:C, :] = mp.astype(o_ref.dtype)
    o_ref[0, C:2 * C, :] = conv.astype(o_ref.dtype)


def downsample(x, w, b, stride=2, *, max_l_tile=2048):
    """Fused ResNet-1D Downsample: concat([MaxPool1d(x), Conv1d(x)], dim=1).

    x: (N, C, L); w: (C, C, K) with K = 2*stride - 1; b: (C,).
    Returns (N, 2C, L_out), L_out = (L + 2p - K)//stride + 1, p = stride - 1.
    """
    N, C_in, L = x.shape
    s = int(stride)
    assert s >= 2, "stride must be >= 2"  # TODO(synk): stride=1 degenerate path
    K = 2 * s - 1
    p = s - 1
    assert w.shape == (C_in, C_in, K) and b.shape == (C_in,)
    L_out = (L + 2 * p - K) // s + 1

    # ---- Channel padding so every sublane slice stays (8,)-aligned (f32). ----
    C = C_in
    if C % 8 != 0:
        C = ((C_in + 7) // 8) * 8
        x = jnp.pad(x, ((0, 0), (0, C - C_in), (0, 0)))
        w = jnp.pad(w, ((0, C - C_in), (0, C - C_in), (0, 0)))
        b = jnp.pad(b, ((0, C - C_in),))

    # ---- Output-length tile size from a VMEM budget (generation-aware). ----
    itemsize = 4
    per_col = 2 * itemsize * (s * C + 2 * C)                  # dbl-buffered in+out
    fixed = 2 * itemsize * (s * C * C + (s - 1) * C * C + C) + (1 << 20)
    try:
        vmem_cap = int(pltpu.get_tpu_info().vmem_capacity_bytes)
    except Exception:
        vmem_cap = 64 << 20                                   # v7x physical (min)
    budget = min(max(vmem_cap // 3, 8 << 20), 24 << 20)
    t_budget = max(128, (budget - fixed) // per_col)
    t_cap = min(int(max_l_tile), int(t_budget))
    if L_out <= t_cap:
        T = L_out                       # single tile: full L, exempt from 128 rule
        n_l = 1
    else:
        T = max(128, (t_cap // 128) * 128)   # lane-dense multiple of 128
        n_l = -(-L_out // T)
    L_ph = n_l * T

    # ---- Glue (one fused XLA pass over x): zero-pad, split into `s` unit-stride
    # phase streams stacked on channels, cut into per-tile slabs with a single
    # lookahead column.  Writes ~1.0x of the input (vs 1.5x for K taps before).
    Lpad_total = s * L_ph + s
    x_pad = jnp.pad(x, ((0, 0), (0, 0), (p, Lpad_total - p - L)))
    phases = [x_pad[:, :, r::s] for r in range(s)]            # each >= L_ph+1 cols
    ph = jnp.concatenate([pf[:, :, :L_ph + 1] for pf in phases], axis=1)
    body = ph[:, :, :L_ph].reshape(N, s * C, n_l, T)          # (N, sC, n_l, T)
    look = ph[:, :, T::T][:, :, :n_l][..., None]              # (N, sC, n_l, 1)
    x_ph = jnp.transpose(jnp.concatenate([body, look], axis=3), (0, 2, 1, 3))
    # -> (N, n_l, s*C, T+1); last two block dims equal the full array dims.

    # Conv weights flattened to match the phase-row order:
    #   w_lo[o, r*C + c] = w[o, c, r]      (taps 0..s-1)
    #   w_hi[o, r*C + c] = w[o, c, s + r]  (taps s..K-1, read from cols [1:T+1])
    w_lo = jnp.transpose(w[:, :, :s], (0, 2, 1)).reshape(C, s * C)
    w_hi = jnp.transpose(w[:, :, s:], (0, 2, 1)).reshape(C, (s - 1) * C)
    b2 = b.reshape(C, 1)

    kernel = functools.partial(
        _downsample_kernel,
        stride=s, ksize=K, pad=p, L=L, L_out=L_out, C=C, T=T)

    # Explicit scoped-VMEM limit (v5e defaults to 16 MiB; v7x physical is 64 MiB).
    vmem_limit = int(min(64 << 20, max(32 << 20, fixed + per_col * (T + 256))))

    out = pl.pallas_call(
        kernel,
        out_shape=jax.ShapeDtypeStruct((N, 2 * C, L_out), x.dtype),
        grid_spec=pltpu.PrefetchScalarGridSpec(
            num_scalar_prefetch=0,
            grid=(N, n_l),
            in_specs=[
                pl.BlockSpec((1, 1, s * C, T + 1), lambda n, l: (n, l, 0, 0)),
                pl.BlockSpec((C, s * C), lambda n, l: (0, 0)),
                pl.BlockSpec((C, (s - 1) * C), lambda n, l: (0, 0)),
                pl.BlockSpec((C, 1), lambda n, l: (0, 0)),
            ],
            out_specs=pl.BlockSpec((1, 2 * C, T), lambda n, l: (n, 0, l)),
        ),
        # Batch elements and L tiles are fully independent -> both parallel
        # (lets v7x shard across its two TensorCores; no-op on v5e/v6e).
        compiler_params=pltpu.CompilerParams(
            dimension_semantics=("parallel", "parallel"),
            vmem_limit_bytes=vmem_limit),
    )(x_ph, w_lo, w_hi, b2)

    if C != C_in:
        out = jnp.concatenate([out[:, :C_in], out[:, C:C + C_in]], axis=1)
    return out


def _reference(x, w, b, stride):
    """Pure-JAX reference (MaxPool1d + Conv1d, concat on channels)."""
    s = int(stride)
    K = 2 * s - 1
    p = s - 1
    mp = lax.reduce_window(
        x, -jnp.inf, lax.max,
        window_dimensions=(1, 1, K), window_strides=(1, 1, s),
        padding=((0, 0), (0, 0), (p, p)))
    cv = lax.conv_general_dilated(
        x, w, window_strides=(s,), padding=((p, p),),
        dimension_numbers=("NCH", "OIH", "NCH")) + b[None, :, None]
    return jnp.concatenate([mp, cv], axis=1)


if __name__ == "__main__":
    key = jax.random.PRNGKey(0)

    def run_case(k, N, C, L, stride, **kw):
        kx, kwt, kb = jax.random.split(k, 3)
        K = 2 * stride - 1
        x = jax.random.normal(kx, (N, C, L), dtype=jnp.float32)
        w = jax.random.normal(kwt, (C, C, K), dtype=jnp.float32) * 0.1
        b = jax.random.normal(kb, (C,), dtype=jnp.float32) * 0.1
        out = jax.block_until_ready(downsample(x, w, b, stride=stride, **kw))
        ref = jax.block_until_ready(_reference(x, w, b, stride))
        assert out.shape == ref.shape, (out.shape, ref.shape)
        err = np.max(np.abs(np.asarray(out) - np.asarray(ref)))
        assert np.allclose(np.asarray(out), np.asarray(ref),
                           atol=5e-4, rtol=5e-4), f"max abs err {err}"

    k1, k2, k3, k4 = jax.random.split(key, 4)
    # Small demo shape (batch=2, channels=8, seq=16, stride=2).
    run_case(k1, N=2, C=8, L=16, stride=2)
    # Multi-tile path: forces T=128 -> two L tiles + cross-tile lookahead column.
    run_case(k2, N=2, C=16, L=300, stride=2, max_l_tile=128)
    # Odd length -> right-edge maxpool masking path.
    run_case(k3, N=1, C=8, L=15, stride=2)
    # Non-default stride (general phase decomposition, K=5).
    run_case(k4, N=1, C=8, L=20, stride=3)

    print("KERNEL_OK")
</pallas_src>

<mosaic_0001>
module attributes {stable_mosaic.version = 11 : i64} {
  func.func @_downsample_kernel(%arg0: i32, %arg1: i32, %arg2: memref<1x1x16x9xf32, #tpu.memory_space<vmem>>, %arg3: memref<8x16xf32, #tpu.memory_space<vmem>>, %arg4: memref<8x8xf32, #tpu.memory_space<vmem>>, %arg5: memref<8x1xf32, #tpu.memory_space<vmem>>, %arg6: memref<1x16x8xf32, #tpu.memory_space<vmem>>) attributes {dimension_semantics = [#tpu.dimension_semantics<parallel>, #tpu.dimension_semantics<parallel>], iteration_bounds = array<i64: 2, 1>, scalar_prefetch = 0 : i64, scratch_operands = 0 : i64, tpu.core_type = #tpu.core_type<tc>, window_params = [{transform_indices = @transform_0, window_bounds = array<i64: 1, 1, 16, 9>}, {pipeline_mode = #tpu.pipeline_mode<synchronous>, transform_indices = @transform_1, window_bounds = array<i64: 8, 16>}, {pipeline_mode = #tpu.pipeline_mode<synchronous>, transform_indices = @transform_2, window_bounds = array<i64: 8, 8>}, {pipeline_mode = #tpu.pipeline_mode<synchronous>, transform_indices = @transform_3, window_bounds = array<i64: 8, 1>}, {transform_indices = @transform_4, window_bounds = array<i64: 1, 16, 8>}]} {
    %c0 = arith.constant 0 : index
    %c0_0 = arith.constant 0 : index
    %0 = vector.load %arg3[%c0, %c0_0] : memref<8x16xf32, #tpu.memory_space<vmem>>, vector<8x16xf32>
    %c0_1 = arith.constant 0 : index
    %c0_2 = arith.constant 0 : index
    %c0_3 = arith.constant 0 : index
    %c0_4 = arith.constant 0 : index
    %1 = vector.load %arg2[%c0_1, %c0_2, %c0_3, %c0_4] : memref<1x1x16x9xf32, #tpu.memory_space<vmem>>, vector<1x1x16x8xf32>
    %2 = vector.shape_cast %1 : vector<1x1x16x8xf32> to vector<16x8xf32>
    %cst = arith.constant dense<0.000000e+00> : vector<8x8xf32>
    %3 = tpu.matmul %0, %2, %cst {dimension_numbers = #tpu.dot_dimension_numbers<[1], [0], [0], [1], [0, 0, 1, 1], [], []>} : vector<8x16xf32>, vector<16x8xf32>, vector<8x8xf32> -> vector<8x8xf32>
    %c0_5 = arith.constant 0 : index
    %c0_6 = arith.constant 0 : index
    %4 = vector.load %arg4[%c0_5, %c0_6] : memref<8x8xf32, #tpu.memory_space<vmem>>, vector<8x8xf32>
    %c0_7 = arith.constant 0 : index
    %c0_8 = arith.constant 0 : index
    %c0_9 = arith.constant 0 : index
    %c1 = arith.constant 1 : index
    %5 = vector.load %arg2[%c0_7, %c0_8, %c0_9, %c1] : memref<1x1x16x9xf32, #tpu.memory_space<vmem>>, vector<1x1x8x8xf32>
    %6 = vector.shape_cast %5 : vector<1x1x8x8xf32> to vector<8x8xf32>
    %cst_10 = arith.constant dense<0.000000e+00> : vector<8x8xf32>
    %7 = tpu.matmul %4, %6, %cst_10 {dimension_numbers = #tpu.dot_dimension_numbers<[1], [0], [0], [1], [0, 0, 1, 1], [], []>} : vector<8x8xf32>, vector<8x8xf32>, vector<8x8xf32> -> vector<8x8xf32>
    %8 = arith.addf %3, %7 : vector<8x8xf32>
    %c0_11 = arith.constant 0 : index
    %c0_12 = arith.constant 0 : index
    %9 = vector.load %arg5[%c0_11, %c0_12] : memref<8x1xf32, #tpu.memory_space<vmem>>, vector<8x1xf32>
    %10 = vector.broadcast %9 : vector<8x1xf32> to vector<8x8xf32>
    %11 = arith.addf %8, %10 : vector<8x8xf32>
    %c8_i32 = arith.constant 8 : i32
    %12 = arith.muli %arg1, %c8_i32 : i32
    %13 = tpu.iota {dimensions = array<i32: 1>} : vector<1x8xi32>
    %14 = vector.broadcast %12 : i32 to vector<1x8xi32>
    %15 = arith.addi %14, %13 : vector<1x8xi32>
    %c0_13 = arith.constant 0 : index
    %c0_14 = arith.constant 0 : index
    %c0_15 = arith.constant 0 : index
    %c0_16 = arith.constant 0 : index
    %16 = vector.load %arg2[%c0_13, %c0_14, %c0_15, %c0_16] : memref<1x1x16x9xf32, #tpu.memory_space<vmem>>, vector<1x1x8x8xf32>
    %17 = vector.shape_cast %16 : vector<1x1x8x8xf32> to vector<8x8xf32>
    %c2_i32 = arith.constant 2 : i32
    %18 = vector.broadcast %c2_i32 : i32 to vector<1x8xi32>
    %19 = arith.muli %18, %15 : vector<1x8xi32>
    %c-1_i32 = arith.constant -1 : i32
    %20 = vector.broadcast %c-1_i32 : i32 to vector<1x8xi32>
    %21 = arith.addi %19, %20 : vector<1x8xi32>
    %c0_i32 = arith.constant 0 : i32
    %22 = vector.broadcast %c0_i32 : i32 to vector<1x8xi32>
    %23 = arith.cmpi sge, %21, %22 : vector<1x8xi32>
    %c16_i32 = arith.constant 16 : i32
    %24 = vector.broadcast %c16_i32 : i32 to vector<1x8xi32>
    %25 = arith.cmpi slt, %21, %24 : vector<1x8xi32>
    %26 = arith.andi %23, %25 : vector<1x8xi1>
    %cst_17 = arith.constant 0xFF800000 : f32
    %27 = vector.shape_cast %26 : vector<1x8xi1> to vector<1x8xi1>
    %28 = vector.broadcast %27 : vector<1x8xi1> to vector<8x8xi1>
    %29 = vector.broadcast %cst_17 : f32 to vector<8x8xf32>
    %30 = arith.select %28, %17, %29 : vector<8x8xi1>, vector<8x8xf32>
    %c0_18 = arith.constant 0 : index
    %c0_19 = arith.constant 0 : index
    %c8 = arith.constant 8 : index
    %c0_20 = arith.constant 0 : index
    %31 = vector.load %arg2[%c0_18, %c0_19, %c8, %c0_20] : memref<1x1x16x9xf32, #tpu.memory_space<vmem>>, vector<1x1x8x8xf32>
    %32 = vector.shape_cast %31 : vector<1x1x8x8xf32> to vector<8x8xf32>
    %33 = arith.maximumf %30, %32 : vector<8x8xf32>
    %c0_21 = arith.constant 0 : index
    %c0_22 = arith.constant 0 : index
    %c0_23 = arith.constant 0 : index
    %c1_24 = arith.constant 1 : index
    %34 = vector.load %arg2[%c0_21, %c0_22, %c0_23, %c1_24] : memref<1x1x16x9xf32, #tpu.memory_space<vmem>>, vector<1x1x8x8xf32>
    %35 = vector.shape_cast %34 : vector<1x1x8x8xf32> to vector<8x8xf32>
    %36 = arith.maximumf %33, %35 : vector<8x8xf32>
    %c0_25 = arith.constant 0 : index
    %c0_26 = arith.constant 0 : index
    %c0_27 = arith.constant 0 : index
    %37 = vector.load %arg6[%c0_25, %c0_26, %c0_27] : memref<1x16x8xf32, #tpu.memory_space<vmem>>, vector<1x8x8xf32>
    %38 = vector.shape_cast %37 : vector<1x8x8xf32> to vector<8x8xf32>
    %39 = vector.shape_cast %36 : vector<8x8xf32> to vector<1x8x8xf32>
    tpu.vector_store %arg6[%c0_25, %c0_26, %c0_27], %39 {strides = array<i32>} : memref<1x16x8xf32, #tpu.memory_space<vmem>>, vector<1x8x8xf32>,
    %c0_28 = arith.constant 0 : index
    %c8_29 = arith.constant 8 : index
    %c0_30 = arith.constant 0 : index
    %40 = vector.load %arg6[%c0_28, %c8_29, %c0_30] : memref<1x16x8xf32, #tpu.memory_space<vmem>>, vector<1x8x8xf32>
    %41 = vector.shape_cast %40 : vector<1x8x8xf32> to vector<8x8xf32>
    %42 = vector.shape_cast %11 : vector<8x8xf32> to vector<1x8x8xf32>
    tpu.vector_store %arg6[%c0_28, %c8_29, %c0_30], %42 {strides = array<i32>} : memref<1x16x8xf32, #tpu.memory_space<vmem>>, vector<1x8x8xf32>,
    return
  }
  func.func @transform_0(%arg0: i32, %arg1: i32) -> (i32, i32, i32, i32) {
    %c0_i32 = arith.constant 0 : i32
    %c0_i32_0 = arith.constant 0 : i32
    %c0_i32_1 = arith.constant 0 : i32
    return %arg0, %arg1, %c0_i32, %c0_i32_0 : i32, i32, i32, i32
  }
  func.func @transform_1(%arg0: i32, %arg1: i32) -> (i32, i32) {
    %c0_i32 = arith.constant 0 : i32
    %c0_i32_0 = arith.constant 0 : i32
    %c0_i32_1 = arith.constant 0 : i32
    return %c0_i32, %c0_i32_0 : i32, i32
  }
  func.func @transform_2(%arg0: i32, %arg1: i32) -> (i32, i32) {
    %c0_i32 = arith.constant 0 : i32
    %c0_i32_0 = arith.constant 0 : i32
    %c0_i32_1 = arith.constant 0 : i32
    return %c0_i32, %c0_i32_0 : i32, i32
  }
  func.func @transform_3(%arg0: i32, %arg1: i32) -> (i32, i32) {
    %c0_i32 = arith.constant 0 : i32
    %c0_i32_0 = arith.constant 0 : i32
    %c0_i32_1 = arith.constant 0 : i32
    return %c0_i32, %c0_i32_0 : i32, i32
  }
  func.func @transform_4(%arg0: i32, %arg1: i32) -> (i32, i32, i32) {
    %c0_i32 = arith.constant 0 : i32
    %c0_i32_0 = arith.constant 0 : i32
    return %arg0, %c0_i32, %arg1 : i32, i32, i32
  }
}

</mosaic_0001>

<bundles_post_ra>
// kernel: tpu_custom_call.1
= control target key start
LH: loop header
LB: loop body
LE: loop exit
PB: predicated region body
PF: predicated region fallthrough
CT: control target
= control target key end

     0   :  { %s491_s15 = smov 0   ;;  %s493_s16 = smov 0   ;;  %s533_s0 = inlined_call_operand.vmem [shape: f32[2,1,16,9], index: 0, kind: input, shape index: {}]   ;;  %s534_s1 = inlined_call_operand.vmem [shape: f32[8,16], index: 1, kind: input, shape index: {}]   ;;  %s535_s2 = inlined_call_operand.vmem [shape: f32[8,8], index: 2, kind: input, shape index: {}]   ;;  %s536_s3 = inlined_call_operand.vmem [shape: f32[8,1], index: 3, kind: input, shape index: {}]   ;;  %s537_s4 = inlined_call_operand.vmem [shape: f32[2,16,8], index: 4, kind: output, shape index: {}]  }
   0x1   :  { %s495_s17 = smov 0  }
   0x2 LB: > { %s26_s18 = sadd.s32 1, %s458_s16  ;;  %p402_p0 = scmp.ge.s32.totalorder %s462_s17, 1  ;;  %s462_s17 = sphi %s495_s17, %s14_s17   ;;  %s458_s16 = sphi %s493_s16, %s539_s16   ;;  %s454_s15 = sphi %s491_s15, %s538_s15  }
   0x3   : > { %p28_p1 = scmp.ge.s32.totalorder %s26_s18, 2  ;;  %p182_p2 = scmp.lt.s32.totalorder %s462_s17, 3 }
   0x5   : > { %s541_s18 = smov (%p28_p1, %s26_s18), 0  ;;  %p183_p3 = pnand %p402_p0, %p182_p2 }
   0x6   : > { %p215_p4 = scmp.lt.s32.totalorder (!%p183_p3), %s454_s15, 1  ;;  %s464_s23 = smov (!%p183_p3), 127  }
   0x7   : > { %186 = sbr.rel (%p183_p3) target bundleno = 263 (0x107), region = 36 }
   0xc   : > { %v296_v0 = vlaneseq  ;;  %s543_s15 = smov (!%p215_p4, %s454_s15), 1  ;;  %v232_v8 = vld [vmem:[%s534_s1] sm:$0xff]  ;;  %vm264_vm3 = vcmask 130048   ;;  %v465_v10 = vmov 0   ;;  %vm240_vm4 = vcmask 64512  }
   0xd   : > { %s411_s19 = sshll.u32 %s543_s15, 4  ;;  %v288_v9 = vld [vmem:[%s536_s3] sm:$0xff]  ;;  %439 = vset.pattern.permute.xlu0 %v465_v10 }
   0xe   : > { %v297_v1 = vand.u32 127, %v296_v0  ;;  %s223_s22 = scalar_lea.vmem %s533_s0, %s411_s19  ;;  %v235_v11 = vld [vmem:[%s535_s2] sm:$0xff]  ;;  %s231_s6 = scalar_lea.vmem %s537_s4, %s411_s19 }
   0xf   : > { %v233_v3 = vld [vmem:[%s223_s22] sm:$0xff]  ;;  %v234_v4 = vld [vmem:[%s223_s22 + $0x8] sm:$0xff] }
  0x10   : > { %v300_v2 = vmul.u32 2, %v297_v1  ;;  %237 = vrot.lane.b32.xlu0 %v233_v3, %s464_s23  ;;  %282 = vmatpush.msra.mxu1 %v234_v4 }
  0x12   : > { %v301_v5 = vadd.s32 4294967295, %v300_v2  ;;  %283 = vmatpush.msra.mxu1 %v233_v3 }
  0x13   : > { %408 = vmatmul.msk.f32.vlgmr.msra.gmra.mxu1 %vm264_vm3, %v232_v8 }
  0x14   : > { %vm302_vm0 = vcmp.ge.s32.totalorder %v301_v5, 0  ;;  %vm303_vm1 = vcmp.lt.s32.totalorder %v301_v5, 16 }
  0x15   : > { %vm304_vm2 = vmand %vm302_vm0, %vm303_vm1 }
  0x16   : > { %v307_v6 = vsel %vm304_vm2, %v233_v3, -inf }
  0x17   : > { %v308_v7 = vmax.f32 %v307_v6, %v234_v4 }
  0x18   : > { %291 = vperm.xlu0 %439, %v288_v9  }
  0x82   : > { %v238_v12 = vpop.permute.xlu0 %237 }
  0x83   : > { %v309_v13 = vmax.f32 %v308_v7, %v238_v12  ;;  %259 = vmatpush.msra.mxu0 %v238_v12 }
  0x84   : > { %407 = vmatmul.msk.f32.vlgmr.msra.gmra.mxu0 %vm240_vm4, %v235_v11 }
  0x85   : > { %310 = vst.msk [vmem:[%s231_s6] sm:$0xff] %vm240_vm4, %v309_v13 }
  0x8a   : > { %v292_v16 = vpop.permute.xlu0 %291 }
  0x90   : > { %v285_v14 = vpop.f32.mrf.mxu1 }
 0x101   : > { %v261_v15 = vpop.f32.mrf.mxu0 }
 0x102   : > { %v286_v17 = vadd.f32 %v285_v14, %v261_v15 }
 0x104   : > { %v294_v18 = vadd.f32 %v292_v16, %v286_v17 }
 0x106   : > { %311 = vst.msk [vmem:[%s231_s6 + $0x8] sm:$0xff] %vm240_vm4, %v294_v18 }
 0x107 PF: > { %s14_s17 = sadd.s32 1, %s462_s17   ;;  %s538_s15 = smov %s458_s16 }
 0x108   : > { %p11_p5 = scmp.ge.s32.totalorder %s14_s17, 4   ;;  %s539_s16 = smov %s541_s18 }
 0x10a   :  { %13 = sbr.rel (!%p11_p5) target bundleno = 2 (0x2), region = 66 }

</bundles_post_ra>
